<compile_context>
chip_gen: v5e
topology: v5e:2x2
jax: 0.10.0
libtpu: 0.0.40
codegen_flags: <defaults>
</compile_context>

<pallas_src>
import functools
import math

import jax
import jax.numpy as jnp
from jax.experimental import pallas as pl
from jax.experimental.pallas import tpu as pltpu

EPS = 1e-12  # matches F.normalize eps


def _round_up(x, m):
    return ((x + m - 1) // m) * m


def _pad_axis(x, axis, size):
    if x.shape[axis] == size:
        return x
    pad = [(0, 0)] * x.ndim
    pad[axis] = (0, size - x.shape[axis])
    return jnp.pad(x, pad)


def _pick_tile(v, cands=(512, 256, 128)):
    for t in cands:
        if v % t == 0:
            return t
    return v


# ----------------------------- Pallas kernels -----------------------------

def _sqdist_kernel(t_ref, st_ref, o_ref):
    # t_ref: (1, TV1, 8) zero-padded coords, st_ref: (1, 8, V2), o_ref: (1, TV1, V2)
    t = t_ref[0]
    st = st_ref[0]
    inner = jnp.dot(t, st, preferred_element_type=jnp.float32)
    t2 = jnp.sum(t * t, axis=-1, keepdims=True)
    s2 = jnp.sum(st * st, axis=0, keepdims=True)
    o_ref[0] = jnp.maximum(t2 + s2 - 2.0 * inner, 0.0)


def _conv_surface_kernel(nd_ref, dirs_ref, o_ref, *, support_num, kernel_num,
                         neighbor_num):
    # nd_ref: (1, N, TV, 8) normalized neighbor directions (bf16)
    # dirs_ref: (8, S*K) normalized kernel directions (bf16)
    m = None
    for n in range(neighbor_num):                       # max over neighbors
        theta = jnp.maximum(
            jnp.dot(nd_ref[0, n], dirs_ref[...],
                    preferred_element_type=jnp.float32), 0.0)     # (TV, S*K) f32
        m = theta if m is None else jnp.maximum(m, theta)
    acc = m[:, 0:kernel_num]
    for s in range(1, support_num):                     # sum over supports
        acc = acc + m[:, s * kernel_num:(s + 1) * kernel_num]
    o_ref[0] = acc.astype(o_ref.dtype)


def _conv_layer_kernel(nd_ref, dirs_ref, center_ref, nbr_ref, o_ref, *,
                       support_num, out_channel, neighbor_num, apply_relu):
    # nd_ref: (1, N, TV, 8) bf16, dirs_ref: (8, S*C) bf16,
    # center_ref: (1, TV, C) bf16, nbr_ref: (1, N, TV, S*C) bf16, o_ref: (1, TV, C)
    m = None
    for n in range(neighbor_num):                       # max over neighbors
        theta = jnp.maximum(
            jnp.dot(nd_ref[0, n], dirs_ref[...],
                    preferred_element_type=jnp.float32), 0.0)     # (TV, S*C) f32
        act = theta * nbr_ref[0, n].astype(jnp.float32)
        m = act if m is None else jnp.maximum(m, act)
    acc = center_ref[0].astype(jnp.float32)
    for s in range(support_num):                        # sum over supports
        acc = acc + m[:, s * out_channel:(s + 1) * out_channel]
    if apply_relu:
        acc = jnp.maximum(acc, 0.0)
    o_ref[0] = acc.astype(o_ref.dtype)


def _matmul_bias_kernel(x_ref, w_ref, b_ref, o_ref):
    # x/w bf16 operands, accumulate + bias in f32, store bf16.
    acc = jnp.dot(x_ref[0], w_ref[...],
                  preferred_element_type=jnp.float32) + b_ref[...]
    o_ref[0] = acc.astype(o_ref.dtype)


def _nbr_max_kernel(x_ref, o_ref, *, neighbor_num):
    # x_ref: (1, Nn, P, C) bf16 -> max over the neighbor axis.
    m = x_ref[0, 0]
    for n in range(1, neighbor_num):
        m = jnp.maximum(m, x_ref[0, n])
    o_ref[0] = m


def _head_kernel(x_ref, w1_ref, b1_ref, w2_ref, b2_ref, w3_ref, b3_ref, o_ref):
    # x/weights bf16; accumulation / bias / relu / log_softmax in f32.
    h = (jnp.dot(x_ref[0], w1_ref[...],
                 preferred_element_type=jnp.float32) + b1_ref[...])
    h = jnp.maximum(h, 0.0)
    h = (jnp.dot(h.astype(jnp.bfloat16), w2_ref[...],
                 preferred_element_type=jnp.float32) + b2_ref[...])
    h = jnp.maximum(h, 0.0)
    logits = (jnp.dot(h.astype(jnp.bfloat16), w3_ref[...],
                      preferred_element_type=jnp.float32) + b3_ref[...])
    mx = jnp.max(logits, axis=-1, keepdims=True)
    z = logits - mx
    lse = jnp.log(jnp.sum(jnp.exp(z), axis=-1, keepdims=True))
    o_ref[0] = z - lse                                   # log_softmax


# ------------------------------- JAX glue ---------------------------------

def pairwise_sqdist(target, source):
    """target (bs,V1,3), source (bs,V2,3) -> squared distances (bs,V1,V2)."""
    bs, v1, _ = target.shape
    v2 = source.shape[1]
    t = _pad_axis(target, 2, 8)                       # pad coord dim 3 -> 8 (zeros)
    st = _pad_axis(jnp.transpose(source, (0, 2, 1)), 1, 8)
    tv1 = _pick_tile(v1)
    return pl.pallas_call(
        _sqdist_kernel,
        out_shape=jax.ShapeDtypeStruct((bs, v1, v2), jnp.float32),
        grid=(bs, v1 // tv1),
        in_specs=[pl.BlockSpec((1, tv1, 8), lambda b, t: (b, t, 0)),
                  pl.BlockSpec((1, 8, v2), lambda b, t: (b, 0, 0))],
        out_specs=pl.BlockSpec((1, tv1, v2), lambda b, t: (b, t, 0)),
        compiler_params=pltpu.CompilerParams(
            dimension_semantics=("parallel", "parallel"),
            vmem_limit_bytes=48 << 20),
    )(t, st)


def get_neighbor_index(vertices, neighbor_num):
    d = pairwise_sqdist(vertices, vertices)
    _, idx = jax.lax.top_k(-d, neighbor_num + 1)      # smallest distances
    return idx[:, :, 1:]                              # drop self


def get_nearest_index(target, source):
    d = pairwise_sqdist(target, source)
    return jnp.argmin(d, axis=-1)                     # (bs, V1)


def indexing_neighbor(tensor, index):
    # tensor (bs, V, C), index (bs, V1, N) -> (bs, V1, N, C)
    return jax.vmap(lambda t, idx: t[idx])(tensor, index)


def neighbor_directions(vertices, neighbor_index):
    """Normalized neighbor directions, neighbor-major 4-D (bs, N, V, 8) bf16
    (coord dim zero-padded 3 -> 8).  Computed ONCE per graph level and reused
    by every conv kernel at that level."""
    bs, v, n = neighbor_index.shape
    nbrs = indexing_neighbor(vertices, neighbor_index)          # (bs, V, N, 3)
    dirs = nbrs - vertices[:, :, None, :]
    sumsq = jnp.sum(dirs * dirs, axis=-1, keepdims=True)
    dirs = dirs * jax.lax.rsqrt(jnp.maximum(sumsq, EPS * EPS))  # == d / max(|d|, eps)
    dirs = jnp.transpose(dirs, (0, 2, 1, 3))                    # (bs, N, V, 3)
    return _pad_axis(dirs, 3, 8).astype(jnp.bfloat16)


def matmul_bias(x_bf16, w_bf16, b_f32):
    bs, v, cin = x_bf16.shape
    cout = w_bf16.shape[1]
    tv = _pick_tile(v)
    return pl.pallas_call(
        _matmul_bias_kernel,
        out_shape=jax.ShapeDtypeStruct((bs, v, cout), jnp.bfloat16),
        grid=(bs, v // tv),
        in_specs=[pl.BlockSpec((1, tv, cin), lambda i, t: (i, t, 0)),
                  pl.BlockSpec((cin, cout), lambda i, t: (0, 0)),
                  pl.BlockSpec((1, cout), lambda i, t: (0, 0))],
        out_specs=pl.BlockSpec((1, tv, cout), lambda i, t: (i, t, 0)),
        compiler_params=pltpu.CompilerParams(
            dimension_semantics=("parallel", "parallel"),
            vmem_limit_bytes=32 << 20),
    )(x_bf16, w_bf16, b_f32)


def conv_surface(nd, dirs_norm, support_num, kernel_num):
    bs, n, v, _ = nd.shape
    tv = _pick_tile(v)
    kern = functools.partial(_conv_surface_kernel, support_num=support_num,
                             kernel_num=kernel_num, neighbor_num=n)
    return pl.pallas_call(
        kern,
        out_shape=jax.ShapeDtypeStruct((bs, v, kernel_num), jnp.bfloat16),
        grid=(bs, v // tv),
        in_specs=[pl.BlockSpec((1, n, tv, 8), lambda b, t: (b, 0, t, 0)),
                  pl.BlockSpec((8, support_num * kernel_num),
                               lambda b, t: (0, 0))],
        out_specs=pl.BlockSpec((1, tv, kernel_num), lambda b, t: (b, t, 0)),
        compiler_params=pltpu.CompilerParams(
            dimension_semantics=("parallel", "parallel"),
            vmem_limit_bytes=32 << 20),
    )(nd, dirs_norm)


def conv_layer(nd, neighbor_index, feature_map_bf16, prep_params, support_num,
               out_channel, apply_relu):
    w_bf16, b_f32, dirs_norm = prep_params
    bs, n, v, _ = nd.shape
    sc = support_num * out_channel
    feature_out = matmul_bias(feature_map_bf16, w_bf16, b_f32)   # (bs, V, (S+1)*C) bf16
    center = feature_out[:, :, :out_channel]
    support = feature_out[:, :, out_channel:]                    # (bs, V, S*C) bf16
    # TODO(synk): move this gather in-kernel (scalar-prefetched indices) to
    # avoid materializing the N-times-duplicated (bs, N, V, S*C) tensor in HBM.
    nbr_sup = indexing_neighbor(support, neighbor_index)         # (bs, V, N, S*C) bf16
    nbr_sup = jnp.transpose(nbr_sup, (0, 2, 1, 3))               # (bs, N, V, S*C)
    tv = _pick_tile(v)
    kern = functools.partial(_conv_layer_kernel, support_num=support_num,
                             out_channel=out_channel, neighbor_num=n,
                             apply_relu=apply_relu)
    return pl.pallas_call(
        kern,
        out_shape=jax.ShapeDtypeStruct((bs, v, out_channel), jnp.bfloat16),
        grid=(bs, v // tv),
        in_specs=[pl.BlockSpec((1, n, tv, 8), lambda b, t: (b, 0, t, 0)),
                  pl.BlockSpec((8, sc), lambda b, t: (0, 0)),
                  pl.BlockSpec((1, tv, out_channel), lambda b, t: (b, t, 0)),
                  pl.BlockSpec((1, n, tv, sc), lambda b, t: (b, 0, t, 0))],
        out_specs=pl.BlockSpec((1, tv, out_channel), lambda b, t: (b, t, 0)),
        compiler_params=pltpu.CompilerParams(
            dimension_semantics=("parallel", "parallel"),
            vmem_limit_bytes=48 << 20),
    )(nd, dirs_norm, center, nbr_sup)


def pool_layer(vertices, feature_map_bf16, pooling_rate, neighbor_num, key):
    bs, v, _ = vertices.shape
    c = feature_map_bf16.shape[-1]
    pool_num = v // pooling_rate
    # TODO(synk): PyTorch uses torch.randperm (nondeterministic across runs,
    # one permutation shared by the whole batch); we use a fixed-key
    # permutation for determinism.
    sample_idx = jax.random.permutation(key, v)[:pool_num]
    nbr_idx = get_neighbor_index(vertices, neighbor_num)         # (bs, V, Nn)
    # Only the sampled vertices survive pooling -> gather / max only those rows.
    nbr_idx_s = nbr_idx[:, sample_idx, :]                        # (bs, P, Nn)
    nbr_feat = indexing_neighbor(feature_map_bf16, nbr_idx_s)    # (bs, P, Nn, C)
    nbr_feat = jnp.transpose(nbr_feat, (0, 2, 1, 3))             # (bs, Nn, P, C)
    kern = functools.partial(_nbr_max_kernel, neighbor_num=neighbor_num)
    pooled = pl.pallas_call(
        kern,
        out_shape=jax.ShapeDtypeStruct((bs, pool_num, c), jnp.bfloat16),
        grid=(bs,),
        in_specs=[pl.BlockSpec((1, neighbor_num, pool_num, c),
                               lambda b: (b, 0, 0, 0))],
        out_specs=pl.BlockSpec((1, pool_num, c), lambda b: (b, 0, 0)),
        compiler_params=pltpu.CompilerParams(
            dimension_semantics=("parallel",), vmem_limit_bytes=32 << 20),
    )(nbr_feat)
    return vertices[:, sample_idx, :], pooled


def head_mlp(x_bf16, head_prep, num_classes):
    """Fused 1x1-Conv1d stack -> log_softmax.  Weights are pre-padded / bf16
    (prepare_params); V padded to a multiple of 128; output sliced back."""
    w1, b1, w2, b2, w3, b3 = head_prep
    bs, v, fp = x_bf16.shape
    vp = _round_up(v, 128)
    if vp != v:
        x_bf16 = _pad_axis(x_bf16, 1, vp)
    tv = _pick_tile(vp, (256, 128))
    h1, h2, cp = w1.shape[1], w2.shape[1], w3.shape[1]
    out = pl.pallas_call(
        _head_kernel,
        out_shape=jax.ShapeDtypeStruct((bs, vp, cp), jnp.float32),
        grid=(bs, vp // tv),
        in_specs=[pl.BlockSpec((1, tv, fp), lambda i, t: (i, t, 0)),
                  pl.BlockSpec((fp, h1), lambda i, t: (0, 0)),
                  pl.BlockSpec((1, h1), lambda i, t: (0, 0)),
                  pl.BlockSpec((h1, h2), lambda i, t: (0, 0)),
                  pl.BlockSpec((1, h2), lambda i, t: (0, 0)),
                  pl.BlockSpec((h2, cp), lambda i, t: (0, 0)),
                  pl.BlockSpec((1, cp), lambda i, t: (0, 0))],
        out_specs=pl.BlockSpec((1, tv, cp), lambda i, t: (i, t, 0)),
        compiler_params=pltpu.CompilerParams(
            dimension_semantics=("parallel", "parallel"),
            vmem_limit_bytes=48 << 20),        # fits v7x's 64 MiB per-TC VMEM
    )(x_bf16, w1, b1, w2, b2, w3, b3)
    return out[:, :v, :num_classes]


# ------------------------------ parameters ---------------------------------

def _uniform(key, shape, stdv):
    return jax.random.uniform(key, shape, jnp.float32, -stdv, stdv)


def init_params(key, num_classes, support_num, cat_num=6):
    s = support_num
    keys = iter(jax.random.split(key, 32))
    p = {}
    # Conv_surface(kernel_num=128, support_num=s)
    p["conv0_dirs"] = _uniform(next(keys), (3, s * 128),
                               1.0 / math.sqrt(s * 128))

    def conv_layer_params(cin, cout):
        stdv = 1.0 / math.sqrt(cout * (s + 1))
        w = _uniform(next(keys), (cin, (s + 1) * cout), stdv)
        b = _uniform(next(keys), ((s + 1) * cout,), stdv)
        d = _uniform(next(keys), (3, s * cout), stdv)
        return (w, b, d)

    p["conv1"] = conv_layer_params(128, 128)
    p["conv2"] = conv_layer_params(128, 256)
    p["conv3"] = conv_layer_params(256, 256)
    p["conv4"] = conv_layer_params(256, 512)

    dim_fuse = 128 + 128 + 256 + 256 + 512 + 512 + cat_num   # 1798

    def linear(cin, cout):
        stdv = 1.0 / math.sqrt(cin)
        return (_uniform(next(keys), (cin, cout), stdv),
                _uniform(next(keys), (cout,), stdv))

    w1, b1 = linear(dim_fuse, 1024)
    w2, b2 = linear(1024, 512)
    w3, b3 = linear(512, num_classes)
    p["head"] = (w1, b1, w2, b2, w3, b3)
    return p


def _normalize_dirs(directions):
    # F.normalize(directions, dim=0), pad 3 -> 8 rows with zeros, bf16 operand.
    sumsq = jnp.sum(directions * directions, axis=0, keepdims=True)
    d = directions * jax.lax.rsqrt(jnp.maximum(sumsq, EPS * EPS))
    return _pad_axis(d, 0, 8).astype(jnp.bfloat16)


def prepare_params(params, num_classes, cat_num=6):
    """One-time device-ready weight prep (hoisted out of forward):
    bf16 weights, reshaped f32 biases, normalized/padded direction matrices,
    W1 zero rows aligned with the 128-col-padded onehot block, W3/b3 padded to
    128 classes with -1e30 bias so the head output store is lane-dense."""
    prep = {"conv0_dirs": _normalize_dirs(params["conv0_dirs"])}

    def prep_conv(p):
        w, b, d = p
        return (w.astype(jnp.bfloat16),
                b.reshape(1, -1).astype(jnp.float32),
                _normalize_dirs(d))

    for k in ("conv1", "conv2", "conv3", "conv4"):
        prep[k] = prep_conv(params[k])

    w1, b1, w2, b2, w3, b3 = params["head"]
    dim_fuse = w1.shape[0]
    cat_pad = _round_up(cat_num, 128)
    fp = (dim_fuse - cat_num) + cat_pad           # onehot block padded to 128 cols
    w1p = jnp.pad(w1, ((0, fp - dim_fuse), (0, 0)))
    cp = _round_up(num_classes, 128)
    w3p = jnp.pad(w3, ((0, 0), (0, cp - num_classes)))
    b3p = jnp.pad(b3, (0, cp - num_classes), constant_values=-1e30)
    prep["head"] = (w1p.astype(jnp.bfloat16), b1.reshape(1, -1),
                    w2.astype(jnp.bfloat16), b2.reshape(1, -1),
                    w3p.astype(jnp.bfloat16), b3p.reshape(1, -1))
    return prep


# -------------------------------- forward ----------------------------------

def forward(prep, vertices, onehot, pool_key, neighbor_num, support_num,
            num_classes):
    bs, vertice_num, _ = vertices.shape
    key1, key2 = jax.random.split(pool_key)

    # level 1 -------------------------------------------------------------
    nbr_idx = get_neighbor_index(vertices, neighbor_num)
    nd0 = neighbor_directions(vertices, nbr_idx)           # shared by conv_0/conv_1
    fm_0 = conv_surface(nd0, prep["conv0_dirs"], support_num, 128)  # >= 0 (relu no-op)
    fm_1 = conv_layer(nd0, nbr_idx, fm_0, prep["conv1"],
                      support_num, 128, apply_relu=True)
    v_pool_1, fm_pool_1 = pool_layer(vertices, fm_1, 4, 4, key1)

    # level 2 -------------------------------------------------------------
    nbr_idx = get_neighbor_index(v_pool_1, neighbor_num)
    nd1 = neighbor_directions(v_pool_1, nbr_idx)           # shared by conv_2/conv_3
    fm_2 = conv_layer(nd1, nbr_idx, fm_pool_1, prep["conv2"],
                      support_num, 256, apply_relu=True)
    fm_3 = conv_layer(nd1, nbr_idx, fm_2, prep["conv3"],
                      support_num, 256, apply_relu=True)
    v_pool_2, fm_pool_2 = pool_layer(v_pool_1, fm_3, 4, 4, key2)

    # level 3 -------------------------------------------------------------
    nbr_idx = get_neighbor_index(v_pool_2, neighbor_num)
    nd2 = neighbor_directions(v_pool_2, nbr_idx)
    fm_4 = conv_layer(nd2, nbr_idx, fm_pool_2, prep["conv4"],
                      support_num, 512, apply_relu=False)
    f_global = jnp.max(fm_4, axis=1)                              # (bs, 512) bf16

    # fuse ----------------------------------------------------------------
    nearest_pool_1 = get_nearest_index(vertices, v_pool_1)        # (bs, V)
    nearest_pool_2 = get_nearest_index(vertices, v_pool_2)
    gather = jax.vmap(lambda t, i: t[i])
    fm_2u = gather(fm_2, nearest_pool_1)
    fm_3u = gather(fm_3, nearest_pool_1)
    fm_4u = gather(fm_4, nearest_pool_2)

    f_global_r = jnp.broadcast_to(f_global[:, None, :],
                                  (bs, vertice_num, f_global.shape[-1]))
    # onehot block padded to 128 cols so the head input is lane-aligned
    # (matching zero rows were added to W1 in prepare_params).
    cat_pad = _round_up(onehot.shape[-1], 128)
    onehot_p = _pad_axis(onehot, 1, cat_pad).astype(jnp.bfloat16)
    onehot_r = jnp.broadcast_to(onehot_p[:, None, :],
                                (bs, vertice_num, cat_pad))
    fm_fuse = jnp.concatenate(
        [fm_0, fm_1, fm_2u, fm_3u, fm_4u, f_global_r, onehot_r], axis=2)  # bf16

    pred = head_mlp(fm_fuse, prep["head"], num_classes)           # log_softmax inside
    return pred


# --------------------------------- main -------------------------------------

if __name__ == "__main__":
    NUM_CLASSES = 8
    SUPPORT_NUM = 1
    NEIGHBOR_NUM = 4
    CAT_NUM = 6
    BS, V = 2, 128

    key = jax.random.PRNGKey(0)
    k_param, k_vert, k_cat, k_pool = jax.random.split(key, 4)

    params = init_params(k_param, NUM_CLASSES, SUPPORT_NUM, CAT_NUM)
    prep = prepare_params(params, NUM_CLASSES, CAT_NUM)   # one-time weight prep

    vertices = jax.random.normal(k_vert, (BS, V, 3), jnp.float32)
    cat_ids = jax.random.randint(k_cat, (BS,), 0, CAT_NUM)
    onehot = jax.nn.one_hot(cat_ids, CAT_NUM, dtype=jnp.float32)

    pred = forward(prep, vertices, onehot, k_pool, NEIGHBOR_NUM, SUPPORT_NUM,
                   NUM_CLASSES)
    pred = jax.block_until_ready(pred)

    assert pred.shape == (BS, V, NUM_CLASSES), pred.shape
    assert bool(jnp.all(jnp.isfinite(pred)))
    # rows of exp(log_softmax) should sum to ~1
    assert bool(jnp.allclose(jnp.sum(jnp.exp(pred), axis=-1), 1.0, atol=1e-3))
    print("KERNEL_OK")
</pallas_src>

<mosaic_0001>
module attributes {stable_mosaic.version = 11 : i64} {
  func.func @_sqdist_kernel(%arg0: i32, %arg1: i32, %arg2: memref<1x128x8xf32, #tpu.memory_space<vmem>>, %arg3: memref<1x8x128xf32, #tpu.memory_space<vmem>>, %arg4: memref<1x128x128xf32, #tpu.memory_space<vmem>>) attributes {dimension_semantics = [#tpu.dimension_semantics<parallel>, #tpu.dimension_semantics<parallel>], iteration_bounds = array<i64: 2, 1>, scalar_prefetch = 0 : i64, scratch_operands = 0 : i64, tpu.core_type = #tpu.core_type<tc>, window_params = [{transform_indices = @transform_0, window_bounds = array<i64: 1, 128, 8>}, {transform_indices = @transform_1, window_bounds = array<i64: 1, 8, 128>}, {transform_indices = @transform_2, window_bounds = array<i64: 1, 128, 128>}]} {
    %c0 = arith.constant 0 : index
    %c0_0 = arith.constant 0 : index
    %c0_1 = arith.constant 0 : index
    %0 = vector.load %arg2[%c0, %c0_0, %c0_1] : memref<1x128x8xf32, #tpu.memory_space<vmem>>, vector<1x128x8xf32>
    %1 = vector.shape_cast %0 : vector<1x128x8xf32> to vector<128x8xf32>
    %c0_2 = arith.constant 0 : index
    %c0_3 = arith.constant 0 : index
    %c0_4 = arith.constant 0 : index
    %2 = vector.load %arg3[%c0_2, %c0_3, %c0_4] : memref<1x8x128xf32, #tpu.memory_space<vmem>>, vector<1x8x128xf32>
    %3 = vector.shape_cast %2 : vector<1x8x128xf32> to vector<8x128xf32>
    %cst = arith.constant dense<0.000000e+00> : vector<128x128xf32>
    %4 = tpu.matmul %1, %3, %cst {dimension_numbers = #tpu.dot_dimension_numbers<[1], [0], [0], [1], [0, 0, 1, 1], [], []>} : vector<128x8xf32>, vector<8x128xf32>, vector<128x128xf32> -> vector<128x128xf32>
    %5 = arith.mulf %1, %1 : vector<128x8xf32>
    %cst_5 = arith.constant dense<0.000000e+00> : vector<128xf32>
    %6 = vector.multi_reduction <add>, %5, %cst_5 [1] : vector<128x8xf32> to vector<128xf32>
    %7 = vector.shape_cast %6 : vector<128xf32> to vector<128x1xf32>
    %8 = arith.mulf %3, %3 : vector<8x128xf32>
    %cst_6 = arith.constant dense<0.000000e+00> : vector<128xf32>
    %9 = vector.multi_reduction <add>, %8, %cst_6 [0] : vector<8x128xf32> to vector<128xf32>
    %10 = vector.shape_cast %9 : vector<128xf32> to vector<1x128xf32>
    %11 = vector.broadcast %7 : vector<128x1xf32> to vector<128x128xf32>
    %12 = vector.broadcast %10 : vector<1x128xf32> to vector<128x128xf32>
    %13 = arith.addf %11, %12 : vector<128x128xf32>
    %cst_7 = arith.constant 2.000000e+00 : f32
    %14 = vector.broadcast %cst_7 : f32 to vector<128x128xf32>
    %15 = arith.mulf %14, %4 : vector<128x128xf32>
    %16 = arith.subf %13, %15 : vector<128x128xf32>
    %cst_8 = arith.constant 0.000000e+00 : f32
    %17 = vector.broadcast %cst_8 : f32 to vector<128x128xf32>
    %18 = arith.maximumf %16, %17 : vector<128x128xf32>
    %c0_9 = arith.constant 0 : index
    %c0_10 = arith.constant 0 : index
    %c0_11 = arith.constant 0 : index
    %19 = vector.load %arg4[%c0_9, %c0_10, %c0_11] : memref<1x128x128xf32, #tpu.memory_space<vmem>>, vector<1x128x128xf32>
    %20 = vector.shape_cast %19 : vector<1x128x128xf32> to vector<128x128xf32>
    %21 = vector.shape_cast %18 : vector<128x128xf32> to vector<1x128x128xf32>
    tpu.vector_store %arg4[%c0_9, %c0_10, %c0_11], %21 {strides = array<i32>} : memref<1x128x128xf32, #tpu.memory_space<vmem>>, vector<1x128x128xf32>,
    return
  }
  func.func @transform_0(%arg0: i32, %arg1: i32) -> (i32, i32, i32) {
    %c0_i32 = arith.constant 0 : i32
    %c0_i32_0 = arith.constant 0 : i32
    return %arg0, %arg1, %c0_i32 : i32, i32, i32
  }
  func.func @transform_1(%arg0: i32, %arg1: i32) -> (i32, i32, i32) {
    %c0_i32 = arith.constant 0 : i32
    %c0_i32_0 = arith.constant 0 : i32
    %c0_i32_1 = arith.constant 0 : i32
    return %arg0, %c0_i32, %c0_i32_0 : i32, i32, i32
  }
  func.func @transform_2(%arg0: i32, %arg1: i32) -> (i32, i32, i32) {
    %c0_i32 = arith.constant 0 : i32
    %c0_i32_0 = arith.constant 0 : i32
    return %arg0, %arg1, %c0_i32 : i32, i32, i32
  }
}

</mosaic_0001>

<bundles_post_ra>
// kernel: tpu_custom_call.1
= control target key start
LH: loop header
LB: loop body
LE: loop exit
PB: predicated region body
PF: predicated region fallthrough
CT: control target
= control target key end

     0   :  { %7 = vsyncpa [#allocation3], 0  ;;  %s974_s0 = inlined_call_operand.vmem [shape: f32[2,128,8], index: 0, kind: input, shape index: {}]   ;;  %s975_s1 = inlined_call_operand.vmem [shape: f32[2,8,128], index: 1, kind: input, shape index: {}]   ;;  %s976_s2 = inlined_call_operand.hbm [shape: f32[2,128,128], index: 2, kind: output, shape index: {}]  }
   0x1   :  { %9 = vsyncpa [#allocation3 + $0x1], 0  ;;  %s770_s9 = smov 0   ;;  %s772_s10 = smov 0  }
   0x2   :  { %s774_s11 = smov 0   ;;  %s776_s12 = smov 0  }
   0x3   :  { %s778_s13 = smov 0   ;;  %s780_s14 = smov 0  }
   0x4 LB: > { %s581_s15 = sadd.s32 4294967295, %s751_s14   ;;  %s582_s16 = sadd.s32 4294967294, %s751_s14   ;;  %s751_s14 = sphi %s780_s14, %s15_s14   ;;  %s747_s13 = sphi %s778_s13, %s983_s13   ;;  %s743_s12 = sphi %s776_s12, %s982_s12   ;;  %s739_s11 = sphi %s774_s11, %s981_s11   ;;  %s735_s10 = sphi %s772_s10, %s980_s10   ;;  %s731_s9 = sphi %s770_s9, %s979_s9  }
   0x5   : > { %s27_s17 = sadd.s32 1, %s747_s13  ;;  %s90_s18 = sadd.s32 1, %s739_s11 }
   0x6   : > { %p29_p0 = scmp.ge.s32.totalorder %s27_s17, 2  ;;  %p100_p1 = scmp.ne.s32.totalorder %s739_s11, %s735_s10 }
   0x7   : > { %p101_p2 = scmp.eq.s32.totalorder %s581_s15, 1  ;;  %p106_p3 = scmp.ne.s32.totalorder %s735_s10, %s731_s9 }
   0x8   : > { %s985_s17 = smov (%p29_p0, %s27_s17), 0  ;;  %p107_p5 = scmp.eq.s32.totalorder %s582_s16, 1 }
   0x9   : > { %p810_p4 = por %p101_p2, %p100_p1  ;;  %s85_s20 = ssub.s32 %s747_s13, %s985_s17 }
   0xa   : > { %p585_p6 = scmp.ge.s32.totalorder %s751_s14, 1  ;;  %p88_p7 = scmp.eq.s32.totalorder %s85_s20, 0 }
   0xb   : > { %p817_p8 = por %p107_p5, %p106_p3  ;;  %p145_p9 = scmp.lt.s32.totalorder %s751_s14, 3 }
   0xc   : > { %s823_s22 = scalar_select %p88_p7, %s739_s11, %s90_s18  }
   0xd   : > { %p146_p10 = pnand %p585_p6, %p145_p9 }
   0xe   : > { %p176_p11 = scmp.lt.s32.totalorder (!%p146_p10), %s743_s12, 1  ;;  %s172_s4 = sand.u32 (!%p146_p10), 1, %s735_s10  }
   0xf   : > { %149 = sbr.rel (%p146_p10) target bundleno = 197 (0xc5), region = 28  ;;  %s586_s5 = sshll.u32 (!%p146_p10), %s172_s4, 7 }
  0x10   : > { %s903_s6 = scalar_lea.vmem (!%p146_p10), [#allocation2], %s586_s5  ;;  %s612_s7 = sshll.u32 (!%p146_p10), %s743_s12, 7 }
  0x11   : > { %s486_s16 = scalar_lea.hbm (!%p146_p10), %s976_s2, %s612_s7  ;;  %s473_s20 = scalar_lea.sflag (!%p146_p10), [#allocation3], %s172_s4 }
  0x12   : > { %s489_s18 = sshll.u32 (!%p146_p10), %s486_s16, 4  ;;  %s693_s27 = scalar_lea.hbm (!%p146_p10), %s976_s2, 256  ;;  %s490_s18 = int_to_ptr.hbm [resolvable:$true] %s489_s18 }
  0x14   : > { %s177_s23 = scalar_select %p176_p11, %s743_s12, 1  ;;  %vm207_vm0 = vcmask 64512  }
  0x15   : > { %s487_s12 = sshll.u32 %s903_s6, 4  ;;  %s488_s12 = int_to_ptr.vmem [resolvable:$true] %s487_s12 }
  0x16   : > { %s611_s24 = sshll.u32 %s177_s23, 7  ;;  %s589_s25 = sshll.u32 %s177_s23, 3 }
  0x17   : > { %s830_s28 = scalar_lea.vmem %s974_s0, %s611_s24  ;;  %s188_s3 = scalar_lea.vmem %s975_s1, %s589_s25 }
  0x18   : > { %v835_v0 = vld [vmem:[%s188_s3] sm:$0xff]  ;;  %v192_v5 = vld [vmem:[%s830_s28 + $0x10] sm:$0xff]  ;;  %v195_v9 = vld [vmem:[%s830_s28 + $0x28] sm:$0xff]  ;;  %s687_s23 = sshra.s32 %s490_s18, 4  ;;  %s688_s23 = int_to_ptr.hbm [resolvable:$true] %s687_s23 }
  0x19   : > { %v190_v1 = vld [vmem:[%s830_s28] sm:$0xff]  ;;  %271 = vmatpush.msra.mxu0 %v835_v0  ;;  %613 = vmatpush.msra.mxu1 %v835_v0  ;;  %v323_v8 = vmul.f32 %v192_v5, %v192_v5  ;;  %v193_v12 = vld [vmem:[%s830_s28 + $0x18] sm:$0xff]  ;;  %v191_v14 = vld [vmem:[%s830_s28 + $0x8] sm:$0xff]  ;;  %v326_v15 = vmul.f32 %v195_v9, %v195_v9  ;;  %v385_v49 = vmul.f32 %v835_v0, %v835_v0  ;;  %s689_s24 = scalar_lea.hbm %s688_s23, 128  ;;  %p694_p1 = scmp.lt.s32.totalorder %s688_s23, %s976_s2 }
  0x1a   : > { %v194_v2 = vld [vmem:[%s830_s28 + $0x20] sm:$0xff]  ;;  %v321_v6 = vmul.f32 %v190_v1, %v190_v1  ;;  %614 = vmatpush.msra.mxu2 %v835_v0  ;;  %590 = vmatmul.msk.f32.vlgmr.msra.gmra.mxu0 %vm207_vm0, %v190_v1  ;;  %v324_v16 = vmul.f32 %v193_v12, %v193_v12  ;;  %v322_v17 = vmul.f32 %v191_v14, %v191_v14  ;;  %v199_v18 = vld [vmem:[%s830_s28 + $0x48] sm:$0xff]  ;;  %v197_v23 = vld [vmem:[%s830_s28 + $0x38] sm:$0xff]  ;;  %p690_p12 = scmp.ne.s32.totalorder %s688_s23, %s689_s24  ;;  %p695_p2 = scmp.lt.s32.totalorder %s693_s27, %s689_s24 }
  0x1b   : > { %v198_v3 = vld [vmem:[%s830_s28 + $0x40] sm:$0xff]  ;;  %v325_v4 = vmul.f32 %v194_v2, %v194_v2  ;;  %594 = vmatmul.msk.f32.vlgmr.msra.gmra.mxu1 %vm207_vm0, %v194_v2  ;;  %615 = vmatpush.msra.mxu3 %v835_v0  ;;  %v343_v13 = vsel %vm207_vm0, %v323_v8, 0.0  ;;  %v352_v19 = vsel %vm207_vm0, %v326_v15, 0.0  ;;  %v203_v20 = vld [vmem:[%s830_s28 + $0x68] sm:$0xff]  ;;  %v196_v24 = vld [vmem:[%s830_s28 + $0x30] sm:$0xff]  ;;  %v328_v26 = vmul.f32 %v197_v23, %v197_v23 }
  0x1c   : > { %v846_v7 = vld [vmem:[%s830_s28 + $0x60] sm:$0xff]  ;;  %598 = vmatmul.msk.f32.vlgmr.msra.gmra.mxu2 %vm207_vm0, %v198_v3  ;;  %v337_v11 = vsel %vm207_vm0, %v321_v6, 0.0  ;;  %344 = vadd.xlane.f32.xlu1 %v343_v13  ;;  %v346_v21 = vsel %vm207_vm0, %v324_v16, 0.0  ;;  %v340_v22 = vsel %vm207_vm0, %v322_v17, 0.0  ;;  %v329_v25 = vmul.f32 %v198_v3, %v198_v3  ;;  %v200_v28 = vld [vmem:[%s830_s28 + $0x50] sm:$0xff]  ;;  %v201_v32 = vld [vmem:[%s830_s28 + $0x58] sm:$0xff]  ;;  %p691_p13 = pnand %p690_p12, %p810_p4  ;;  %p696_p3 = por %p695_p2, %p694_p1 }
  0x1d   : > { %v349_v10 = vsel %vm207_vm0, %v325_v4, 0.0  ;;  %602 = vmatmul.msk.f32.vlgmr.msra.gmra.mxu3 %vm207_vm0, %v846_v7  ;;  %338 = vadd.xlane.f32.xlu0 %v337_v11  ;;  %v327_v27 = vmul.f32 %v196_v24, %v196_v24  ;;  %v204_v30 = vld [vmem:[%s830_s28 + $0x70] sm:$0xff]  ;;  %v358_v31 = vsel %vm207_vm0, %v328_v26, 0.0  ;;  %v332_v34 = vmul.f32 %v201_v32, %v201_v32  ;;  %v205_v38 = vld [vmem:[%s830_s28 + $0x78] sm:$0xff] }
  0x1e   : > { %350 = vadd.xlane.f32.xlu2 %v349_v10  ;;  %v361_v29 = vsel %vm207_vm0, %v329_v25, 0.0  ;;  %v331_v35 = vmul.f32 %v200_v28, %v200_v28  ;;  %v330_v36 = vmul.f32 %v199_v18, %v199_v18  ;;  %v335_v41 = vmul.f32 %v204_v30, %v204_v30  ;;  %p692_p0 = pneg %p691_p13 }
  0x1f   : > { %v355_v33 = vsel %vm207_vm0, %v327_v27, 0.0  ;;  %v370_v37 = vsel %vm207_vm0, %v332_v34, 0.0  ;;  %v334_v42 = vmul.f32 %v203_v20, %v203_v20  ;;  %v333_v43 = vmul.f32 %v846_v7, %v846_v7 }
  0x20   : > { %v367_v39 = vsel %vm207_vm0, %v331_v35, 0.0  ;;  %v364_v40 = vsel %vm207_vm0, %v330_v36, 0.0  ;;  %v379_v44 = vsel %vm207_vm0, %v335_v41, 0.0  ;;  %v336_v47 = vmul.f32 %v205_v38, %v205_v38  ;;  %p697_p5 = pnand %p696_p3, %p692_p0 }
  0x21   : > { %v376_v45 = vsel %vm207_vm0, %v334_v42, 0.0  ;;  %v373_v46 = vsel %vm207_vm0, %v333_v43, 0.0  ;;  %v386_v50 = vrot.slane %v385_v49, 4 }
  0x22   : > { %591 = vmatmul.msk.f32.gmra.mxu0 %vm207_vm0, %v191_v14  ;;  %v382_v48 = vsel %vm207_vm0, %v336_v47, 0.0 }
  0x23   : > { %595 = vmatmul.msk.f32.gmra.mxu1 %vm207_vm0, %v195_v9  ;;  %v387_v51 = vadd.f32 %v386_v50, %v385_v49 }
  0x24   : > { %599 = vmatmul.msk.f32.gmra.mxu2 %vm207_vm0, %v199_v18  ;;  %347 = vadd.xlane.f32.xlu1 %v346_v21 }
  0x25   : > { %603 = vmatmul.msk.f32.gmra.mxu3 %vm207_vm0, %v203_v20  ;;  %341 = vadd.xlane.f32.xlu0 %v340_v22  ;;  %v388_v52 = vrot.slane %v387_v51, 2 }
  0x26   : > { %353 = vadd.xlane.f32.xlu2 %v352_v19 }
  0x27   : > { %v389_v53 = vadd.f32 %v388_v52, %v387_v51 }
  0x29   : > { %v390_v55 = vrot.slane %v389_v53, 1 }
  0x2a   : > { %592 = vmatmul.msk.f32.gmra.mxu0 %vm207_vm0, %v192_v5 }
  0x2b   : > { %596 = vmatmul.msk.f32.gmra.mxu1 %vm207_vm0, %v196_v24  ;;  %v896_v58 = vadd.f32 %v390_v55, %v389_v53 }
  0x2c   : > { %600 = vmatmul.msk.f32.gmra.mxu2 %vm207_vm0, %v200_v28  ;;  %359 = vadd.xlane.f32.xlu1 %v358_v31 }
  0x2d   : > { %604 = vmatmul.msk.f32.gmra.mxu3 %vm207_vm0, %v204_v30  ;;  %356 = vadd.xlane.f32.xlu0 %v355_v33 }
  0x2e   : > { %362 = vadd.xlane.f32.xlu2 %v361_v29 }
  0x32   : > { %593 = vmatmul.msk.f32.gmra.mxu0 %vm207_vm0, %v193_v12 }
  0x33   : > { %597 = vmatmul.msk.f32.gmra.mxu1 %vm207_vm0, %v197_v23 }
  0x34   : > { %601 = vmatmul.msk.f32.gmra.mxu2 %vm207_vm0, %v201_v32  ;;  %368 = vadd.xlane.f32.xlu1 %v367_v39 }
  0x35   : > { %605 = vmatmul.msk.f32.gmra.mxu3 %vm207_vm0, %v205_v38  ;;  %365 = vadd.xlane.f32.xlu0 %v364_v40 }
  0x36   : > { %371 = vadd.xlane.f32.xlu2 %v370_v37 }
  0x3c   : > { %377 = vadd.xlane.f32.xlu1 %v376_v45 }
  0x3d   : > { %374 = vadd.xlane.f32.xlu0 %v373_v46 }
  0x3e   : > { %380 = vadd.xlane.f32.xlu2 %v379_v44 }
  0x45   : > { %383 = vadd.xlane.f32.xlu0 %v382_v48 }
  0x8f   : > { %v345_v56 = vpop.xlane.xlu1 %344 }
  0x90   : > { %v339_v57 = vpop.xlane.xlu0 %338  ;;  %v394_v30 = vadd.f32 %v896_v58, %v345_v56 }
  0x91   : > { %v351_v54 = vpop.xlane.xlu2 %350  ;;  %v392_v62 = vadd.f32 %v896_v58, %v339_v57 }
  0x92   : > { %v396_v59 = vadd.f32 %v896_v58, %v351_v54 }
  0x97   : > { %v273_v61 = vpop.f32.mrf.mxu0  ;;  %v348_v0 = vpop.xlane.xlu1 %347 }
  0x98   : > { %v285_v63 = vpop.f32.mrf.mxu1  ;;  %v408_v1 = vmul.f32 2.0, %v273_v61  ;;  %v342_v3 = vpop.xlane.xlu0 %341  ;;  %v395_v51 = vadd.f32 %v896_v58, %v348_v0 }
  0x99   : > { %v354_v60 = vpop.xlane.xlu2 %353  ;;  %v412_v2 = vmul.f32 2.0, %v285_v63  ;;  %v393_v13 = vadd.f32 %v896_v58, %v342_v3 }
  0x9a   : > { %v424_v4 = vsub.f32 %v392_v62, %v408_v1  ;;  %v397_v9 = vadd.f32 %v896_v58, %v354_v60 }
  0x9b   : > { %v428_v5 = vsub.f32 %v396_v59, %v412_v2 }
  0x9c   : > { %v440_v6 = vmax.f32 %v424_v4, 0.0 }
  0x9d   : > { %v444_v7 = vmax.f32 %v428_v5, 0.0 }
  0x9e   : > { %456 = vst [vmem:[%s903_s6] sm:$0xff] %v440_v6 }
  0x9f   : > { %v297_v8 = vpop.f32.mrf.mxu2  ;;  %460 = vst [vmem:[%s903_s6 + $0x20] sm:$0xff] %v444_v7  ;;  %v276_v12 = vpop.f32.mrf.mxu0 }
  0xa0   : > { %v416_v10 = vmul.f32 2.0, %v297_v8  ;;  %v309_v14 = vpop.f32.mrf.mxu3  ;;  %v288_v16 = vpop.f32.mrf.mxu1  ;;  %v409_v17 = vmul.f32 2.0, %v276_v12 }
  0xa1   : > { %v363_v11 = vpop.xlane.xlu2 %362  ;;  %v413_v18 = vmul.f32 2.0, %v288_v16  ;;  %v360_v19 = vpop.xlane.xlu1 %359  ;;  %v420_v52 = vmul.f32 2.0, %v309_v14 }
  0xa2   : > { %v400_v15 = vadd.f32 %v896_v58, %v363_v11  ;;  %v357_v20 = vpop.xlane.xlu0 %356  ;;  %v425_v22 = vsub.f32 %v393_v13, %v409_v17  ;;  %v399_v57 = vadd.f32 %v896_v58, %v360_v19 }
  0xa3   : > { %v429_v23 = vsub.f32 %v397_v9, %v413_v18  ;;  %v398_v35 = vadd.f32 %v896_v58, %v357_v20 }
  0xa4   : > { %v432_v21 = vsub.f32 %v400_v15, %v416_v10  ;;  %v441_v25 = vmax.f32 %v425_v22, 0.0 }
  0xa5   : > { %v445_v26 = vmax.f32 %v429_v23, 0.0 }
  0xa6   : > { %v448_v24 = vmax.f32 %v432_v21, 0.0  ;;  %457 = vst [vmem:[%s903_s6 + $0x8] sm:$0xff] %v441_v25 }
  0xa7   : > { %v300_v27 = vpop.f32.mrf.mxu2  ;;  %461 = vst [vmem:[%s903_s6 + $0x28] sm:$0xff] %v445_v26  ;;  %v279_v29 = vpop.f32.mrf.mxu0 }
  0xa8   : > { %464 = vst [vmem:[%s903_s6 + $0x40] sm:$0xff] %v448_v24  ;;  %v417_v31 = vmul.f32 2.0, %v300_v27  ;;  %v312_v32 = vpop.f32.mrf.mxu3  ;;  %v291_v33 = vpop.f32.mrf.mxu1  ;;  %v410_v34 = vmul.f32 2.0, %v279_v29 }
  0xa9   : > { %v372_v28 = vpop.xlane.xlu2 %371  ;;  %v414_v36 = vmul.f32 2.0, %v291_v33  ;;  %v369_v37 = vpop.xlane.xlu1 %368  ;;  %v421_v1 = vmul.f32 2.0, %v312_v32 }
  0xaa   : > { %v366_v38 = vpop.xlane.xlu0 %365  ;;  %v426_v40 = vsub.f32 %v394_v30, %v410_v34  ;;  %v402_v45 = vadd.f32 %v896_v58, %v369_v37  ;;  %v403_v15 = vadd.f32 %v896_v58, %v372_v28 }
  0xab   : > { %v401_v39 = vadd.f32 %v896_v58, %v366_v38  ;;  %v430_v41 = vsub.f32 %v398_v35, %v414_v36 }
  0xac   : > { %v442_v43 = vmax.f32 %v426_v40, 0.0 }
  0xad   : > { %v433_v42 = vsub.f32 %v401_v39, %v417_v31  ;;  %v446_v44 = vmax.f32 %v430_v41, 0.0 }
  0xae   : > { %458 = vst [vmem:[%s903_s6 + $0x10] sm:$0xff] %v442_v43 }
  0xaf   : > { %v449_v46 = vmax.f32 %v433_v42, 0.0  ;;  %v303_v47 = vpop.f32.mrf.mxu2  ;;  %462 = vst [vmem:[%s903_s6 + $0x30] sm:$0xff] %v446_v44  ;;  %v282_v50 = vpop.f32.mrf.mxu0 }
  0xb0   : > { %v418_v48 = vmul.f32 2.0, %v303_v47  ;;  %v315_v53 = vpop.f32.mrf.mxu3  ;;  %v294_v55 = vpop.f32.mrf.mxu1  ;;  %v411_v56 = vmul.f32 2.0, %v282_v50 }
  0xb1   : > { %v381_v49 = vpop.xlane.xlu2 %380  ;;  %465 = vst [vmem:[%s903_s6 + $0x48] sm:$0xff] %v449_v46  ;;  %v422_v60 = vmul.f32 2.0, %v315_v53  ;;  %v415_v61 = vmul.f32 2.0, %v294_v55  ;;  %v378_v62 = vpop.xlane.xlu1 %377 }
  0xb2   : > { %v406_v54 = vadd.f32 %v896_v58, %v381_v49  ;;  %v434_v59 = vsub.f32 %v402_v45, %v418_v48  ;;  %v375_v63 = vpop.xlane.xlu0 %374  ;;  %v405_v0 = vadd.f32 %v896_v58, %v378_v62  ;;  %v427_v3 = vsub.f32 %v395_v51, %v411_v56 }
  0xb3   : > { %v404_v2 = vadd.f32 %v896_v58, %v375_v63  ;;  %v431_v6 = vsub.f32 %v399_v57, %v415_v61 }
  0xb4   : > { %v450_v4 = vmax.f32 %v434_v59, 0.0  ;;  %v438_v5 = vsub.f32 %v406_v54, %v422_v60  ;;  %v437_v7 = vsub.f32 %v405_v0, %v421_v1  ;;  %v443_v9 = vmax.f32 %v427_v3, 0.0 }
  0xb5   : > { %v436_v8 = vsub.f32 %v404_v2, %v420_v52  ;;  %v447_v11 = vmax.f32 %v431_v6, 0.0 }
  0xb6   : > { %466 = vst [vmem:[%s903_s6 + $0x50] sm:$0xff] %v450_v4  ;;  %v454_v10 = vmax.f32 %v438_v5, 0.0  ;;  %v453_v12 = vmax.f32 %v437_v7, 0.0 }
  0xb7   : > { %v452_v13 = vmax.f32 %v436_v8, 0.0  ;;  %459 = vst [vmem:[%s903_s6 + $0x18] sm:$0xff] %v443_v9  ;;  %v306_v14 = vpop.f32.mrf.mxu2 }
  0xb8   : > { %470 = vst [vmem:[%s903_s6 + $0x70] sm:$0xff] %v454_v10  ;;  %v419_v16 = vmul.f32 2.0, %v306_v14  ;;  %v318_v17 = vpop.f32.mrf.mxu3 }
  0xb9   : > { %463 = vst [vmem:[%s903_s6 + $0x38] sm:$0xff] %v447_v11  ;;  %v423_v19 = vmul.f32 2.0, %v318_v17 }
  0xba   : > { %469 = vst [vmem:[%s903_s6 + $0x68] sm:$0xff] %v453_v12  ;;  %v435_v18 = vsub.f32 %v403_v15, %v419_v16  ;;  %v384_v20 = vpop.xlane.xlu0 %383 }
  0xbb   : > { %468 = vst [vmem:[%s903_s6 + $0x60] sm:$0xff] %v452_v13  ;;  %v407_v21 = vadd.f32 %v896_v58, %v384_v20 }
  0xbc   : > { %v451_v22 = vmax.f32 %v435_v18, 0.0 }
  0xbd   : > { %v439_v23 = vsub.f32 %v407_v21, %v423_v19 }
  0xbe   : > { %467 = vst [vmem:[%s903_s6 + $0x58] sm:$0xff] %v451_v22 }
  0xbf   : > { %v455_v24 = vmax.f32 %v439_v23, 0.0 }
  0xc1   : > { %471 = vst [vmem:[%s903_s6 + $0x78] sm:$0xff] %v455_v24 }
  0xc2   : > { %700 = shalt.err (!%p697_p5)
}
  0xc3   : > { %s753_s30 = smov 128   ;;  %s754_s3 = smov 8  }
  0xc4   : > { %616 = dma.vmem_to_hbm [thread:$0]  (%p810_p4), %s488_s12, 2048, %s490_s18, %s473_s20, %s753_s30, %s753_s30, %s754_s3  }
  0xc5 PF: > { %p622_p6 = scmp.ge.s32.totalorder %s751_s14, 2  ;;  %s504_s4 = sand.u32 1, %s731_s9  }
  0xc6   : > { %s505_s5 = scalar_lea.sflag [#allocation3], %s504_s4 }
  0xc7   : > { %p619_p7 = pnand %p622_p6, %p817_p8 }
  0xc9   : > { %p620_p9 = pneg %p619_p7 }
  0xcb   : > { %726 = dma.done.wait (%p620_p9), %s505_s5, 2048  }
  0xcc   : > { %728 = vsyncadd (%p620_p9), %s505_s5, 4294965248  ;;  %s15_s14 = sadd.s32 1, %s751_s14   ;;  %s979_s9 = smov %s735_s10 }
  0xcd   : > { %p12_p10 = scmp.ge.s32.totalorder %s15_s14, 4   ;;  %s980_s10 = smov %s739_s11 }
  0xce   : > { %s981_s11 = smov %s823_s22  ;;  %s982_s12 = smov %s747_s13 }
  0xcf   : > { %s983_s13 = smov %s985_s17  ;;  %14 = sbr.rel (!%p12_p10) target bundleno = 4 (0x4), region = 66 }
  0xd4   :  { %511 = vsyncpa [#allocation3], 1 }
  0xd5   :  { %513 = vsyncpa [#allocation3 + $0x1], 1 }

</bundles_post_ra>
